<compile_context>
chip_gen: v5e
topology: v5e:2x2
jax: 0.10.0
libtpu: 0.0.40
codegen_flags: <defaults>
</compile_context>

<pallas_src>
import jax
import jax.numpy as jnp
from jax.experimental import pallas as pl
from jax.experimental.pallas import tpu as pltpu


# --------------------------------------------------------------------------
# Pallas kernel: fused (w1*x+b1) -> (w2*.+b2) -> (w3*.+b3)
# --------------------------------------------------------------------------
def _mixed_kernel(p_ref, x_ref, o_ref):
    # p_ref: SMEM f32[6] = [w1, b1, w2, b2, w3, b3]
    x = x_ref[...].astype(jnp.float32)
    y = x * p_ref[0] + p_ref[1]   # fully_trainable:     Conv1d(1,1,1)
    y = y * p_ref[2] + p_ref[3]   # partially_trainable: Conv1d(1,1,1), frozen bias
    y = y * p_ref[4] + p_ref[5]   # non_trainable:       Conv1d(1,1,1), frozen w+b
    # TODO(synk): Dropout(0.5) is treated as identity (inference semantics).
    o_ref[...] = y.astype(o_ref.dtype)


# Slabs smaller than this go through a single full-array VMEM block.
_SINGLE_BLOCK_BYTES = 4 << 20  # 4 MiB of input comfortably fits in scoped VMEM.


def mixed_forward(x, w1, b1, w2, b2, w3, b3):
    """x: (N, C=1, L) float32, PyTorch Conv1d layout. Returns (N, 1, L)."""
    N, C, L = x.shape
    assert C == 1, "MixedTrainable uses Conv1d(1, 1, 1): single channel"
    M = N * C
    x2d = x.reshape(M, L)

    params = jnp.stack([
        w1.reshape(()), b1.reshape(()),
        w2.reshape(()), b2.reshape(()),
        w3.reshape(()), b3.reshape(()),
    ]).astype(jnp.float32)

    nbytes = M * L * x2d.dtype.itemsize
    tileable = (nbytes > _SINGLE_BLOCK_BYTES) and (M % 8 == 0) and (L % 128 == 0)

    if not tileable:
        # Tiny slab (the fixture case): one DMA in, one DMA out, no grid.
        out = pl.pallas_call(
            _mixed_kernel,
            out_shape=jax.ShapeDtypeStruct((M, L), x.dtype),
            in_specs=[
                pl.BlockSpec(memory_space=pltpu.MemorySpace.SMEM),   # scalars
                pl.BlockSpec(memory_space=pltpu.MemorySpace.VMEM),   # activations
            ],
            out_specs=pl.BlockSpec(memory_space=pltpu.MemorySpace.VMEM),
        )(params, x2d)
    else:
        # Large slab: pipeline over rows with big (8,128)-aligned tiles so
        # HBM traffic double-buffers behind the VPU (mem-bound kernel).
        tm = 8
        while tm * 2 <= M and M % (tm * 2) == 0 and (tm * 2) * L * 4 <= (2 << 20):
            tm *= 2
        grid = (M // tm,)
        out = pl.pallas_call(
            _mixed_kernel,
            out_shape=jax.ShapeDtypeStruct((M, L), x.dtype),
            grid_spec=pltpu.PrefetchScalarGridSpec(
                num_scalar_prefetch=0,
                grid=grid,
                in_specs=[
                    pl.BlockSpec(memory_space=pltpu.MemorySpace.SMEM),
                    pl.BlockSpec((tm, L), lambda i: (i, 0)),
                ],
                out_specs=pl.BlockSpec((tm, L), lambda i: (i, 0)),
            ),
            compiler_params=pltpu.CompilerParams(
                dimension_semantics=("parallel",)),
        )(params, x2d)

    return out.reshape(N, C, L)


# --------------------------------------------------------------------------
# Parameter init (matches PyTorch Conv1d(1,1,1): scalar weight + scalar bias,
# both init'd U(-1/sqrt(fan_in), 1/sqrt(fan_in)) with fan_in = 1).
# --------------------------------------------------------------------------
def init_params(key):
    ks = jax.random.split(key, 6)
    u = lambda k: jax.random.uniform(k, (), jnp.float32, -1.0, 1.0)
    return dict(
        w1=u(ks[0]), b1=u(ks[1]),   # fully_trainable
        w2=u(ks[2]), b2=u(ks[3]),   # partially_trainable (bias frozen)
        w3=u(ks[4]), b3=u(ks[5]),   # non_trainable (weight + bias frozen)
    )


@jax.jit
def mixed_trainable_forward(params, x):
    return mixed_forward(
        x,
        params["w1"], params["b1"],
        params["w2"], params["b2"],
        params["w3"], params["b3"],
    )


if __name__ == "__main__":
    key = jax.random.PRNGKey(0)
    kp, kx = jax.random.split(key)
    params = init_params(kp)

    # (batch=2, channels=1, seq=128) -- the layout nn.Conv1d expects.
    x = jax.random.normal(kx, (2, 1, 128), jnp.float32)

    out = mixed_trainable_forward(params, x)
    jax.block_until_ready(out)
    assert out.shape == (2, 1, 128)

    # Pure-JAX reference of the same forward (dropout = identity).
    ref = x
    ref = ref * params["w1"] + params["b1"]
    ref = ref * params["w2"] + params["b2"]
    ref = ref * params["w3"] + params["b3"]
    assert jnp.allclose(out, ref, rtol=1e-6, atol=1e-6)

    print("KERNEL_OK")
</pallas_src>

<mosaic_0001>
module attributes {stable_mosaic.version = 11 : i64} {
  func.func @_mixed_kernel(%arg0: memref<6xf32, #tpu.memory_space<smem>>, %arg1: memref<2x128xf32, #tpu.memory_space<vmem>>, %arg2: memref<2x128xf32, #tpu.memory_space<vmem>>) attributes {dimension_semantics = [], scalar_prefetch = 0 : i64, scratch_operands = 0 : i64, tpu.core_type = #tpu.core_type<tc>} {
    %c0 = arith.constant 0 : index
    %c0_0 = arith.constant 0 : index
    %0 = vector.load %arg1[%c0, %c0_0] : memref<2x128xf32, #tpu.memory_space<vmem>>, vector<2x128xf32>
    %c0_1 = arith.constant 0 : index
    %1 = memref.load %arg0[%c0_1] : memref<6xf32, #tpu.memory_space<smem>>
    %2 = vector.broadcast %1 : f32 to vector<2x128xf32>
    %3 = arith.mulf %0, %2 : vector<2x128xf32>
    %c1 = arith.constant 1 : index
    %4 = memref.load %arg0[%c1] : memref<6xf32, #tpu.memory_space<smem>>
    %5 = vector.broadcast %4 : f32 to vector<2x128xf32>
    %6 = arith.addf %3, %5 : vector<2x128xf32>
    %c2 = arith.constant 2 : index
    %7 = memref.load %arg0[%c2] : memref<6xf32, #tpu.memory_space<smem>>
    %8 = vector.broadcast %7 : f32 to vector<2x128xf32>
    %9 = arith.mulf %6, %8 : vector<2x128xf32>
    %c3 = arith.constant 3 : index
    %10 = memref.load %arg0[%c3] : memref<6xf32, #tpu.memory_space<smem>>
    %11 = vector.broadcast %10 : f32 to vector<2x128xf32>
    %12 = arith.addf %9, %11 : vector<2x128xf32>
    %c4 = arith.constant 4 : index
    %13 = memref.load %arg0[%c4] : memref<6xf32, #tpu.memory_space<smem>>
    %14 = vector.broadcast %13 : f32 to vector<2x128xf32>
    %15 = arith.mulf %12, %14 : vector<2x128xf32>
    %c5 = arith.constant 5 : index
    %16 = memref.load %arg0[%c5] : memref<6xf32, #tpu.memory_space<smem>>
    %17 = vector.broadcast %16 : f32 to vector<2x128xf32>
    %18 = arith.addf %15, %17 : vector<2x128xf32>
    %c0_2 = arith.constant 0 : index
    %c0_3 = arith.constant 0 : index
    %19 = vector.load %arg2[%c0_2, %c0_3] : memref<2x128xf32, #tpu.memory_space<vmem>>, vector<2x128xf32>
    tpu.vector_store %arg2[%c0_2, %c0_3], %18 {strides = array<i32>} : memref<2x128xf32, #tpu.memory_space<vmem>>, vector<2x128xf32>,
    return
  }
}

</mosaic_0001>

<bundles_post_ra>
// kernel: mixed_trainable_forward.1
= control target key start
LH: loop header
LB: loop body
LE: loop exit
PB: predicated region body
PF: predicated region fallthrough
CT: control target
= control target key end

     0   :  { %7 = vsyncpa [#allocation4], 0  ;;  %s135_s0 = inlined_call_operand.vmem [shape: f32[6], index: 0, kind: input, shape index: {}]   ;;  %s136_s1 = inlined_call_operand.vmem [shape: f32[2,128], index: 1, kind: input, shape index: {}]   ;;  %s137_s2 = inlined_call_operand.hbm [shape: f32[2,128], index: 2, kind: output, shape index: {}]  }
   0x1   :  { %8 = vsyncpa [#allocation3], 0  ;;  %s14_s11 = sshll.u32 %s135_s0, 4  ;;  %s109_s12 = smov [#allocation2]   ;;  %s15_s11 = int_to_ptr.vmem [resolvable:$true] %s14_s11 }
   0x2   :  { %17 = dma.vmem_to_smem %s15_s11, 16, %s109_s12, [#allocation4]  }
   0x3   :  { %105 = dma.done.wait [#allocation4], 16  }
   0x4   :  { %106 = vsyncadd [#allocation4], 4294967280 }
   0x5   :  { %24 = sfence }
   0x6   :  { %s26_s13 = sld [smem:[#allocation2]]  ;;  %v25_v0 = vld [vmem:[%s136_s1] sm:$0x3]  ;;  %s110_s0 = smov [#allocation5]  }
   0x7   :  { %s62_s14 = sld [smem:[#allocation2 + $0x1]]  ;;  %s50_s21 = sshll.u32 %s110_s0, 4  ;;  %s51_s21 = int_to_ptr.vmem [resolvable:$true] %s50_s21 }
   0x8   :  { %s63_s15 = sld [smem:[#allocation2 + $0x2]]  ;;  %s52_s24 = sshll.u32 %s137_s2, 4  ;;  %s53_s24 = int_to_ptr.hbm [resolvable:$true] %s52_s24 }
   0x9   :  { %s64_s16 = sld [smem:[#allocation2 + $0x3]] }
   0xa   :  { %s65_s19 = sld [smem:[#allocation2 + $0x4]] }
   0xb   :  { %s66_s20 = sld [smem:[#allocation2 + $0x5]] }
   0xc   :  { %v27_v1 = vstv %s26_s13 }
   0xd   :  { %v28_v2 = vmul.f32 %v27_v1, %v25_v0  ;;  %v30_v3 = vstv %s62_s14 }
   0xe   :  { %v33_v4 = vstv %s63_s15 }
   0xf   :  { %v31_v5 = vadd.f32 %v30_v3, %v28_v2  ;;  %v36_v6 = vstv %s64_s16 }
  0x10   :  { %v39_v8 = vstv %s65_s19 }
  0x11   :  { %v34_v7 = vmul.f32 %v33_v4, %v31_v5  ;;  %v42_v10 = vstv %s66_s20 }
  0x13   :  { %v37_v9 = vadd.f32 %v36_v6, %v34_v7 }
  0x15   :  { %v40_v11 = vmul.f32 %v39_v8, %v37_v9 }
  0x17   :  { %v43_v12 = vadd.f32 %v42_v10, %v40_v11 }
  0x19   :  { %44 = vst [vmem:[#allocation5] sm:$0x3] %v43_v12 }
  0x1a   :  { %55 = dma.vmem_to_hbm [thread:$0]  %s51_s21, 32, %s53_s24, [#allocation3]  }
  0x1b   :  { %107 = dma.done.wait [#allocation3], 32  }
  0x1c   :  { %108 = vsyncadd [#allocation3], 4294967264 }
  0x1d   :  { %60 = vsyncpa [#allocation3], 1 }
  0x1e   :  { %61 = vsyncpa [#allocation4], 1 }

</bundles_post_ra>
